<compile_context>
chip_gen: v7x
topology: tpu7x:2x2x1
jax: 0.10.0
libtpu: 0.0.40
codegen_flags: <defaults>
</compile_context>

<pallas_src>
import functools

import jax
import jax.numpy as jnp
from jax import lax
from jax.experimental import pallas as pl
from jax.experimental.pallas import tpu as pltpu

_LANE = 128
_SUBLANE = 8
_NEG_INF = -1e30


def _decoder_kernel(
    x_ref,      # VMEM (Tp, H)   embedded tokens (row t = embedding(token_t))
    h0_ref,     # VMEM (1, H)    initial hidden state
    wg_ref,     # VMEM (2H, 4H)  fused gate weights [[Wir^T Wiz^T Win^T 0],[Whr^T Whz^T 0 Whn^T]]
    bg_ref,     # VMEM (1, 4H)   packed biases [b_ir+b_hr, b_iz+b_hz, b_in, b_hn]
    wout_ref,   # VMEM (H, Vp)   W_out^T, zero-padded to Vp lanes
    bout_ref,   # VMEM (1, Vp)   b_out, padded lanes = -1e30
    logp_ref,   # VMEM (Tp, Vp)  out: per-step log-probs (lane/sublane-dense slab)
    hout_ref,   # VMEM (1, H)    out: final hidden state
    *, T, H,
):
    # Deterministic padded rows (sliced off in the wrapper).
    logp_ref[...] = jnp.zeros_like(logp_ref)

    wg = wg_ref[...]
    bg = bg_ref[...]
    wout = wout_ref[...]
    bout = bout_ref[...]

    def step(t, h):
        x = x_ref[pl.ds(t, 1), :]                              # (1, H)
        xh = jnp.concatenate([x, h], axis=1)                   # (1, 2H)
        # One lane-dense MXU op for all four gate products (+ one packed bias add).
        g = jnp.dot(xh, wg, preferred_element_type=jnp.float32) + bg   # (1, 4H)

        r = jax.nn.sigmoid(g[:, 0:H])
        z = jax.nn.sigmoid(g[:, H:2 * H])
        i_n = g[:, 2 * H:3 * H]          # already includes b_in
        h_n = g[:, 3 * H:4 * H]          # already includes b_hn
        n = jnp.tanh(i_n + r * h_n)
        h_new = (1.0 - z) * n + z * h                          # (1, H)

        # output = log_softmax(out(h_new)) over the lane-padded vocab dimension.
        logits = jnp.dot(h_new, wout, preferred_element_type=jnp.float32) + bout
        m = jnp.max(logits, axis=-1, keepdims=True)
        lse = jnp.log(jnp.sum(jnp.exp(logits - m), axis=-1, keepdims=True)) + m
        logp_ref[pl.ds(t, 1), :] = logits - lse                # VMEM-only store; slab flushed once
        return h_new

    h_last = lax.fori_loop(0, T, step, h0_ref[...], unroll=(T <= 16))
    hout_ref[...] = h_last


def prepare_params(raw):
    """One-time layout prep (outside jit): fuse / transpose / pad the PyTorch-layout params."""
    emb = jnp.asarray(raw["embedding"], jnp.float32)
    V, H = emb.shape
    Vp = ((V + _LANE - 1) // _LANE) * _LANE

    w_ih = jnp.asarray(raw["w_ih"], jnp.float32)   # (3H, H), PyTorch gate order r, z, n
    w_hh = jnp.asarray(raw["w_hh"], jnp.float32)
    b_ih = jnp.asarray(raw["b_ih"], jnp.float32)
    b_hh = jnp.asarray(raw["b_hh"], jnp.float32)
    w_out = jnp.asarray(raw["w_out"], jnp.float32)  # (V, H)
    b_out = jnp.asarray(raw["b_out"], jnp.float32)

    w_ir, w_iz, w_in = (w_ih[g * H:(g + 1) * H] for g in range(3))
    w_hr, w_hz, w_hn = (w_hh[g * H:(g + 1) * H] for g in range(3))
    zeros = jnp.zeros((H, H), jnp.float32)

    # xh = [x, h] (1, 2H);  xh @ w_gates = (r_pre, z_pre, i_n, h_n) without biases.
    top = jnp.concatenate([w_ir.T, w_iz.T, w_in.T, zeros], axis=1)   # rows hit by x
    bot = jnp.concatenate([w_hr.T, w_hz.T, zeros, w_hn.T], axis=1)   # rows hit by h
    w_gates = jnp.concatenate([top, bot], axis=0)                    # (2H, 4H)

    b_gates = jnp.concatenate([
        b_ih[0:H] + b_hh[0:H],            # r
        b_ih[H:2 * H] + b_hh[H:2 * H],    # z
        b_ih[2 * H:3 * H],                # i_n
        b_hh[2 * H:3 * H],                # h_n
    ]).reshape(1, 4 * H)

    # TODO(synk): cast w_gates / w_out_t / emb to bf16 (f32 accumulation) for realistic sizes.
    w_out_t = jnp.zeros((H, Vp), jnp.float32).at[:, :V].set(w_out.T)
    b_out_p = jnp.full((1, Vp), _NEG_INF, jnp.float32).at[0, :V].set(b_out)

    return {
        "emb": emb,            # (V, H) — gathered in the wrapper, never enters the kernel
        "w_gates": w_gates,    # (2H, 4H)
        "b_gates": b_gates,    # (1, 4H)
        "w_out_t": w_out_t,    # (H, Vp)
        "b_out_p": b_out_p,    # (1, Vp)
    }


@jax.jit
def decoder_rnn_decode(tokens, hidden, prepared):
    """Fused T-step decode: tokens (T,) int32, hidden (1, 1, H).

    Returns (log_probs (T, V), hidden (1, 1, H)); step t matches DecoderRNN.forward.
    """
    emb = prepared["emb"]
    V, H = emb.shape
    Vp = prepared["w_out_t"].shape[1]
    T = tokens.shape[0]
    Tp = ((T + _SUBLANE - 1) // _SUBLANE) * _SUBLANE

    toks = tokens.reshape(T).astype(jnp.int32)
    x_seq = jnp.take(emb, toks, axis=0)                 # nn.Embedding lookup (gather)
    x_seq = jnp.pad(x_seq, ((0, Tp - T), (0, 0)))       # sublane-pad the step axis
    h0 = hidden.reshape(1, H).astype(jnp.float32)

    vmem = pl.BlockSpec(memory_space=pltpu.MemorySpace.VMEM)
    kernel = functools.partial(_decoder_kernel, T=T, H=H)

    logp_p, h_last = pl.pallas_call(
        kernel,
        out_shape=(jax.ShapeDtypeStruct((Tp, Vp), jnp.float32),
                   jax.ShapeDtypeStruct((1, H), jnp.float32)),
        in_specs=[vmem, vmem, vmem, vmem, vmem, vmem],
        out_specs=(vmem, vmem),
        compiler_params=pltpu.CompilerParams(vmem_limit_bytes=32 * 1024 * 1024),
    )(x_seq, h0, prepared["w_gates"], prepared["b_gates"],
      prepared["w_out_t"], prepared["b_out_p"])

    return logp_p[:T, :V], h_last.reshape(1, 1, H)


def decoder_rnn_forward(token, hidden, prepared):
    """Exact DecoderRNN.forward semantics: one token -> (log_probs (1, V), hidden (1, 1, H))."""
    tokens = jnp.reshape(token, (1,)).astype(jnp.int32)
    return decoder_rnn_decode(tokens, hidden, prepared)


def init_params(key, hidden_size, output_size):
    """Deterministic synthetic params in PyTorch layout, uniform(-1/sqrt(H), 1/sqrt(H))."""
    H, V = hidden_size, output_size
    ks = jax.random.split(key, 7)
    bound = 1.0 / jnp.sqrt(H)
    u = lambda k, shape: jax.random.uniform(k, shape, jnp.float32, -bound, bound)
    return {
        "embedding": jax.random.normal(ks[0], (V, H), jnp.float32),
        "w_ih": u(ks[1], (3 * H, H)),   # PyTorch GRU weight_ih_l0 (gate order r, z, n)
        "w_hh": u(ks[2], (3 * H, H)),   # PyTorch GRU weight_hh_l0
        "b_ih": u(ks[3], (3 * H,)),
        "b_hh": u(ks[4], (3 * H,)),
        "w_out": u(ks[5], (V, H)),      # nn.Linear(H, V).weight
        "b_out": u(ks[6], (V,)),
    }


def _reference_decode(token_ids, hidden, raw):
    """Plain-JAX reference of the PyTorch module, stepped token by token."""
    emb = raw["embedding"]
    H = emb.shape[1]
    w_ih, w_hh, b_ih, b_hh = raw["w_ih"], raw["w_hh"], raw["b_ih"], raw["b_hh"]
    h = hidden.reshape(1, H)
    outs = []
    for tok in token_ids:
        x = emb[tok].reshape(1, H)
        gi = x @ w_ih.T + b_ih
        gh = h @ w_hh.T + b_hh
        i_r, i_z, i_n = gi[:, :H], gi[:, H:2 * H], gi[:, 2 * H:]
        h_r, h_z, h_n = gh[:, :H], gh[:, H:2 * H], gh[:, 2 * H:]
        r = jax.nn.sigmoid(i_r + h_r)
        z = jax.nn.sigmoid(i_z + h_z)
        n = jnp.tanh(i_n + r * h_n)
        h = (1.0 - z) * n + z * h
        logits = h @ raw["w_out"].T + raw["b_out"]
        outs.append(jax.nn.log_softmax(logits, axis=-1))
    return jnp.concatenate(outs, axis=0), h.reshape(1, 1, H)


if __name__ == "__main__":
    hidden_size = 32
    output_size = 64

    key = jax.random.PRNGKey(0)
    raw = init_params(key, hidden_size, output_size)
    prepared = prepare_params(raw)

    token_ids = [5, 17, 3, 42]
    tokens = jnp.array(token_ids, dtype=jnp.int32)
    hidden = jnp.zeros((1, 1, hidden_size), dtype=jnp.float32)   # initHidden()

    # Single-step forward (exact module semantics).
    log_probs1, hidden1 = decoder_rnn_forward(tokens[0], hidden, prepared)
    jax.block_until_ready((log_probs1, hidden1))
    assert log_probs1.shape == (1, output_size)
    assert hidden1.shape == (1, 1, hidden_size)

    # Fused multi-step decode: one kernel call, weights resident, in-kernel step loop.
    log_probs, hidden_T = decoder_rnn_decode(tokens, hidden, prepared)
    jax.block_until_ready((log_probs, hidden_T))
    assert log_probs.shape == (len(token_ids), output_size)
    assert hidden_T.shape == (1, 1, hidden_size)

    # Correctness vs. plain-JAX reference of the PyTorch module.
    ref_lp, ref_h = _reference_decode(token_ids, hidden, raw)
    assert jnp.allclose(jnp.sum(jnp.exp(log_probs), axis=-1), 1.0, atol=1e-4)
    assert jnp.allclose(log_probs, ref_lp, atol=1e-2, rtol=1e-2)
    assert jnp.allclose(hidden_T, ref_h, atol=1e-2, rtol=1e-2)
    assert jnp.allclose(log_probs1, ref_lp[0:1], atol=1e-2, rtol=1e-2)

    print("KERNEL_OK")
</pallas_src>

<mosaic_0001>
module attributes {stable_mosaic.version = 11 : i64} {
  func.func @_decoder_kernel(%arg0: memref<8x32xf32, #tpu.memory_space<vmem>>, %arg1: memref<1x32xf32, #tpu.memory_space<vmem>>, %arg2: memref<64x128xf32, #tpu.memory_space<vmem>>, %arg3: memref<1x128xf32, #tpu.memory_space<vmem>>, %arg4: memref<32x128xf32, #tpu.memory_space<vmem>>, %arg5: memref<1x128xf32, #tpu.memory_space<vmem>>, %arg6: memref<8x128xf32, #tpu.memory_space<vmem>>, %arg7: memref<1x32xf32, #tpu.memory_space<vmem>>) attributes {dimension_semantics = [], scalar_prefetch = 0 : i64, scratch_operands = 0 : i64, tpu.core_type = #tpu.core_type<tc>} {
    %cst = arith.constant 0.000000e+00 : f32
    %0 = vector.broadcast %cst : f32 to vector<8x128xf32>
    %c0 = arith.constant 0 : index
    %c0_0 = arith.constant 0 : index
    %1 = vector.load %arg6[%c0, %c0_0] : memref<8x128xf32, #tpu.memory_space<vmem>>, vector<8x128xf32>
    tpu.vector_store %arg6[%c0, %c0_0], %0 {strides = array<i32>} : memref<8x128xf32, #tpu.memory_space<vmem>>, vector<8x128xf32>,
    %c0_1 = arith.constant 0 : index
    %c0_2 = arith.constant 0 : index
    %2 = vector.load %arg2[%c0_1, %c0_2] : memref<64x128xf32, #tpu.memory_space<vmem>>, vector<64x128xf32>
    %c0_3 = arith.constant 0 : index
    %c0_4 = arith.constant 0 : index
    %3 = vector.load %arg3[%c0_3, %c0_4] : memref<1x128xf32, #tpu.memory_space<vmem>>, vector<1x128xf32>
    %c0_5 = arith.constant 0 : index
    %c0_6 = arith.constant 0 : index
    %4 = vector.load %arg4[%c0_5, %c0_6] : memref<32x128xf32, #tpu.memory_space<vmem>>, vector<32x128xf32>
    %c0_7 = arith.constant 0 : index
    %c0_8 = arith.constant 0 : index
    %5 = vector.load %arg5[%c0_7, %c0_8] : memref<1x128xf32, #tpu.memory_space<vmem>>, vector<1x128xf32>
    %c0_9 = arith.constant 0 : index
    %c0_10 = arith.constant 0 : index
    %6 = vector.load %arg1[%c0_9, %c0_10] : memref<1x32xf32, #tpu.memory_space<vmem>>, vector<1x32xf32>
    %c0_i32 = arith.constant 0 : i32
    %7 = arith.index_cast %c0_i32 : i32 to index
    %c0_11 = arith.constant 0 : index
    %8 = vector.load %arg0[%7, %c0_11] : memref<8x32xf32, #tpu.memory_space<vmem>>, vector<1x32xf32>
    %9 = tpu.concatenate %8, %6 in 1 : vector<1x32xf32>, vector<1x32xf32> -> vector<1x64xf32>
    %cst_12 = arith.constant dense<0.000000e+00> : vector<1x128xf32>
    %10 = tpu.matmul %9, %2, %cst_12 {dimension_numbers = #tpu.dot_dimension_numbers<[1], [0], [0], [1], [0, 0, 1, 1], [], []>} : vector<1x64xf32>, vector<64x128xf32>, vector<1x128xf32> -> vector<1x128xf32>
    %11 = arith.addf %10, %3 : vector<1x128xf32>
    %12 = vector.extract_strided_slice %11 {offsets = [0, 0], sizes = [1, 32], strides = [1, 1]} : vector<1x128xf32> to vector<1x32xf32>
    %13 = arith.negf %12 : vector<1x32xf32>
    %14 = math.exp %13 : vector<1x32xf32>
    %cst_13 = arith.constant 1.000000e+00 : f32
    %15 = vector.broadcast %cst_13 : f32 to vector<1x32xf32>
    %16 = arith.addf %15, %14 : vector<1x32xf32>
    %17 = arith.divf %15, %16 : vector<1x32xf32>
    %18 = vector.extract_strided_slice %11 {offsets = [0, 32], sizes = [1, 32], strides = [1, 1]} : vector<1x128xf32> to vector<1x32xf32>
    %19 = arith.negf %18 : vector<1x32xf32>
    %20 = math.exp %19 : vector<1x32xf32>
    %cst_14 = arith.constant 1.000000e+00 : f32
    %21 = vector.broadcast %cst_14 : f32 to vector<1x32xf32>
    %22 = arith.addf %21, %20 : vector<1x32xf32>
    %23 = arith.divf %21, %22 : vector<1x32xf32>
    %24 = vector.extract_strided_slice %11 {offsets = [0, 64], sizes = [1, 32], strides = [1, 1]} : vector<1x128xf32> to vector<1x32xf32>
    %25 = vector.extract_strided_slice %11 {offsets = [0, 96], sizes = [1, 32], strides = [1, 1]} : vector<1x128xf32> to vector<1x32xf32>
    %26 = arith.mulf %17, %25 : vector<1x32xf32>
    %27 = arith.addf %24, %26 : vector<1x32xf32>
    %28 = math.tanh %27 : vector<1x32xf32>
    %cst_15 = arith.constant 1.000000e+00 : f32
    %29 = vector.broadcast %cst_15 : f32 to vector<1x32xf32>
    %30 = arith.subf %29, %23 : vector<1x32xf32>
    %31 = arith.mulf %30, %28 : vector<1x32xf32>
    %32 = arith.mulf %23, %6 : vector<1x32xf32>
    %33 = arith.addf %31, %32 : vector<1x32xf32>
    %cst_16 = arith.constant dense<0.000000e+00> : vector<1x128xf32>
    %34 = tpu.matmul %33, %4, %cst_16 {dimension_numbers = #tpu.dot_dimension_numbers<[1], [0], [0], [1], [0, 0, 1, 1], [], []>} : vector<1x32xf32>, vector<32x128xf32>, vector<1x128xf32> -> vector<1x128xf32>
    %35 = arith.addf %34, %5 : vector<1x128xf32>
    %cst_17 = arith.constant dense<0xFF800000> : vector<1xf32>
    %36 = vector.multi_reduction <maximumf>, %35, %cst_17 [1] : vector<1x128xf32> to vector<1xf32>
    %37 = vector.shape_cast %36 : vector<1xf32> to vector<1x1xf32>
    %38 = vector.broadcast %37 : vector<1x1xf32> to vector<1x128xf32>
    %39 = arith.subf %35, %38 : vector<1x128xf32>
    %40 = math.exp %39 : vector<1x128xf32>
    %cst_18 = arith.constant dense<0.000000e+00> : vector<1xf32>
    %41 = vector.multi_reduction <add>, %40, %cst_18 [1] : vector<1x128xf32> to vector<1xf32>
    %42 = vector.shape_cast %41 : vector<1xf32> to vector<1x1xf32>
    %43 = math.log %42 : vector<1x1xf32>
    %44 = arith.addf %43, %37 : vector<1x1xf32>
    %45 = vector.broadcast %44 : vector<1x1xf32> to vector<1x128xf32>
    %46 = arith.subf %35, %45 : vector<1x128xf32>
    %47 = arith.index_cast %c0_i32 : i32 to index
    %c0_19 = arith.constant 0 : index
    %48 = vector.load %arg6[%47, %c0_19] : memref<8x128xf32, #tpu.memory_space<vmem>>, vector<1x128xf32>
    tpu.vector_store %arg6[%47, %c0_19], %46 {strides = array<i32>} : memref<8x128xf32, #tpu.memory_space<vmem>>, vector<1x128xf32>,
    %c1_i32 = arith.constant 1 : i32
    %c0_20 = arith.constant 0 : index
    %c0_21 = arith.constant 0 : index
    %49 = vector.load %arg7[%c0_20, %c0_21] : memref<1x32xf32, #tpu.memory_space<vmem>>, vector<1x32xf32>
    tpu.vector_store %arg7[%c0_20, %c0_21], %33 {strides = array<i32>} : memref<1x32xf32, #tpu.memory_space<vmem>>, vector<1x32xf32>,
    return
  }
}

</mosaic_0001>

<bundles_post_ra>
// kernel: decoder_rnn_decode.1
= control target key start
LH: loop header
LB: loop body
LE: loop exit
PB: predicated region body
PF: predicated region fallthrough
CT: control target
= control target key end

     0   :  { %s370_s30 = smov 32   ;;  %v371_v3 = vmov 0.0|0.0   ;;  %v372_v7 = vmov 0.0   ;;  %vm373_vm0 = vmmov 0   ;;  %s487_s0 = inlined_call_operand.vmem [shape: f32[8,32], index: 0, kind: input, shape index: {}]   ;;  %s488_s1 = inlined_call_operand.vmem [shape: f32[1,32], index: 1, kind: input, shape index: {}]   ;;  %s489_s2 = inlined_call_operand.vmem [shape: f32[64,128], index: 2, kind: input, shape index: {}]   ;;  %s490_s3 = inlined_call_operand.vmem [shape: f32[1,128], index: 3, kind: input, shape index: {}]   ;;  %s491_s4 = inlined_call_operand.vmem [shape: f32[32,128], index: 4, kind: input, shape index: {}]   ;;  %s492_s5 = inlined_call_operand.vmem [shape: f32[1,128], index: 5, kind: input, shape index: {}]   ;;  %s493_s6 = inlined_call_operand.vmem [shape: f32[8,128], index: 6, kind: output, shape index: {0}]   ;;  %s494_s7 = inlined_call_operand.hbm [shape: f32[1,32], index: 7, kind: output, shape index: {1}]  }
   0x1   :  { %v263_v0 = vld [vmem:[%s488_s1] ss:$0 sm:$0xff]  ;;  %v28_v2 = vld [vmem:[%s489_s2 + $0x8] sm:$0xff]  ;;  %311 = vmatprep.subr.bf16.mxu0 %v371_v3  ;;  %v29_v5 = vld [vmem:[%s489_s2 + $0x10] sm:$0xff]  ;;  %26 = vst [vmem:[%s493_s6] sm:$0xff] %v372_v7  ;;  %297 = vmatprep.mubr.msk.f32.mxu0 %vm373_vm0, %v372_v7 }
   0x2   :  { %v27_v1 = vld [vmem:[%s489_s2] sm:$0xff]  ;;  %48 = vrot.lane.b32.xlu0 %v263_v0, %s370_s30  ;;  %v30_v6 = vld [vmem:[%s489_s2 + $0x18] sm:$0xff]  ;;  %323 = vmatprep.subr.bf16.mxu1 %v371_v3 }
   0x3   :  { %v312_v4 = vpack.c.bf16 %v28_v2, %v27_v1  ;;  %v315_v8 = vpack.c.bf16 %v30_v6, %v29_v5  ;;  %308 = vmatprep.mubr.msk.f32.mxu1 %vm373_vm0, %v372_v7 }
   0x5   :  { %313 = vmatpush3.bf16.msra.mxu0 %v312_v4 }
   0x6   :  { %13 = vsyncpa [#allocation3], 0  ;;  %314 = vmatprep.subr.bf16.mxu0 %v371_v3  ;;  %v31_v9 = vld [vmem:[%s489_s2 + $0x20] sm:$0xff]  ;;  %v32_v10 = vld [vmem:[%s489_s2 + $0x28] sm:$0xff]  ;;  %vm51_vm1 = vcmask 261120   ;;  %vm53_vm2 = vcmask 523264  }
   0x7   :  { %v318_v11 = vpack.c.bf16 %v32_v10, %v31_v9  ;;  %v33_v12 = vld [vmem:[%s489_s2 + $0x30] sm:$0xff]  ;;  %v34_v13 = vld [vmem:[%s489_s2 + $0x38] sm:$0xff]  ;;  %v42_v15 = vld [vmem:[%s487_s0] sm:$0x1]  ;;  %s374_s0 = smov 64   ;;  %s375_s8 = smov 96  }
   0x8   :  { %v321_v14 = vpack.c.bf16 %v34_v13, %v33_v12  ;;  %v35_v18 = vld [vmem:[%s490_s3] sm:$0x1]  ;;  %v37_v31 = vld [vmem:[%s491_s4 + $0x8] sm:$0xff]  ;;  %v38_v32 = vld [vmem:[%s491_s4 + $0x10] sm:$0xff]  ;;  %vm243_vm3 = vcmask 253952   ;;  %vm227_vm4 = vcmask 1040384  }
   0x9   :  { %316 = vmatpush3.bf16.msra.mxu0 %v315_v8  ;;  %v36_v30 = vld [vmem:[%s491_s4] sm:$0xff]  ;;  %v39_v34 = vld [vmem:[%s491_s4 + $0x18] sm:$0xff]  ;;  %s376_s10 = smov [#allocation2]  }
   0xa   :  { %317 = vmatprep.subr.bf16.mxu0 %v371_v3  ;;  %v324_v33 = vpack.c.bf16 %v37_v31, %v36_v30  ;;  %v327_v35 = vpack.c.bf16 %v39_v34, %v38_v32  ;;  %v40_v43 = vld [vmem:[%s492_s5] sm:$0x1]  ;;  %s253_s1 = sshll.u32 %s376_s10, 4  ;;  %s254_s1 = int_to_ptr.vmem [resolvable:$true] %s253_s1 }
   0xb   :  { %s346_s11 = scalar_lea.vmem %s254_s1, 16  ;;  %s350_s12 = scalar_lea.vmem %s254_s1, 32 }
   0xc   :  { %325 = vmatpush3.bf16.msra.mxu1 %v324_v33  ;;  %p347_p0 = scmp.ne.s32.totalorder %s254_s1, %s346_s11  ;;  %p351_p1 = scmp.lt.s32.totalorder %s254_s1, %s254_s1 }
   0xd   :  { %319 = vmatpush3.bf16.msra.mxu0 %v318_v11  ;;  %326 = vmatprep.subr.bf16.mxu1 %v371_v3  ;;  %p352_p2 = scmp.lt.s32.totalorder %s350_s12, %s346_s11 }
   0xe   :  { %320 = vmatprep.subr.bf16.mxu0 %v371_v3 }
   0xf   :  { %p353_p3 = por %p352_p2, %p351_p1 }
  0x10   :  { %328 = vmatpush3.bf16.msra.mxu1 %v327_v35 }
  0x11   :  { %322 = vmatpush3.bf16.msra.mxu0 %v321_v14  ;;  %p354_p4 = pnand %p353_p3, %p347_p0 }
  0x74   :  { %v49_v16 = vpop.permute.xlu0 %48 }
  0x75   :  { %v52_v17 = vsel %vm51_vm1, %v42_v15, %v49_v16 }
  0x76   :  { %298 = vmatmul.mubr.msk.f32.vlgmr.msra.gmra.mrb[0].mxu0 %vm53_vm2, %v52_v17 }
 0x149   :  { %v123_v19 = vpop.f32.mrb[0].mxu0 }
 0x14a   :  { %v124_v20 = vadd.f32 %v123_v19, %v35_v18  ;;  %v299_v21 = vpop.f32.mrb[1].mxu0 }
 0x14c   :  { %134 = vrot.lane.b32.xlu0 %v124_v20, %s370_s30  ;;  %v265_v22 = vmul.f32 -1.442695, %v124_v20 }
 0x14e   :  { %336 = vpow2.f32 %v265_v22 }
 0x158   :  { %v337_v23 = vpop.eup %336 }
 0x159   :  { %v130_v24 = vadd.f32 1.0, %v337_v23 }
 0x15b   :  { %338 = vrcp.f32 %v130_v24 }
 0x165   :  { %v339_v25 = vpop.eup %338 }
 0x166   :  { %v144_v37 = vsub.f32 1.0, %v339_v25  ;;  %v150_v39 = vmul.f32 %v339_v25, %v49_v16 }
 0x1be   :  { %v135_v26 = vpop.permute.xlu0 %134 }
 0x1bf   :  { %v137_v27 = vmul.f32 %v339_v25, %v135_v26 }
 0x1c1   :  { %139 = vrot.lane.b32.xlu1 %v137_v27, %s374_s0 }
 0x233   :  { %v140_v28 = vpop.permute.xlu1 %139 }
 0x234   :  { %v142_v29 = vadd.f32 %v140_v28, %v124_v20 }
 0x236   :  { %340 = vtanh.f32 %v142_v29 }
 0x240   :  { %v341_v36 = vpop.eup %340 }
 0x241   :  { %146 = vrot.lane.b32.xlu1 %v341_v36, %s375_s8 }
 0x2b3   :  { %v147_v38 = vpop.permute.xlu1 %146 }
 0x2b4   :  { %v149_v40 = vmul.f32 %v147_v38, %v144_v37 }
 0x2b6   :  { %v151_v41 = vadd.f32 %v150_v39, %v149_v40 }
 0x2b8   :  { %153 = vrot.lane.b32.xlu0 %v151_v41, %s375_s8 }
 0x32a   :  { %v154_v42 = vpop.permute.xlu0 %153 }
 0x32b   :  { %309 = vmatmul.mubr.msk.f32.vlgmr.msra.gmra.mrb[0].mxu1 %vm51_vm1, %v154_v42  ;;  %244 = vst.msk [vmem:[#allocation2] sm:$0x1] %vm243_vm3, %v154_v42 }
 0x3fe   :  { %v223_v44 = vpop.f32.mrb[0].mxu1 }
 0x3ff   :  { %v224_v45 = vadd.f32 %v223_v44, %v40_v43  ;;  %v310_v46 = vpop.f32.mrb[1].mxu1 }
 0x401   :  { %v228_v47 = vsel %vm227_vm4, %v224_v45, -inf }
 0x402   :  { %229 = vmax.xlane.f32.xlu1 %v228_v47 }
 0x48f   :  { %v230_v48 = vpop.xlane.xlu1 %229 }
 0x490   :  { %v231_v49 = vsub.f32 %v224_v45, %v230_v48 }
 0x492   :  { %v232_v50 = vmul.f32 1.442695, %v231_v49 }
 0x494   :  { %342 = vpow2.f32 %v232_v50 }
 0x49e   :  { %v343_v51 = vpop.eup %342 }
 0x49f   :  { %v234_v52 = vsel %vm227_vm4, %v343_v51, 0.0 }
 0x4a0   :  { %235 = vadd.xlane.f32.xlu0 %v234_v52 }
 0x4a1   :  { %357 = shalt.err (!%p354_p4)
}
 0x4a2   :  { %s358_s14 = scalar_lea.hbm %s494_s7, 16 }
 0x4a3   :  { %p359_p5 = scmp.ne.s32.totalorder %s494_s7, %s358_s14  ;;  %p362_p6 = scmp.lt.u32.totalorder %s358_s14, %s494_s7 }
 0x4a5   :  { %p364_p7 = pnand %p362_p6, %p359_p5 }
 0x4a7   :  { %367 = shalt.err (!%p364_p7)
}
 0x4a8   :  { %256 = dma.vmem_to_hbm [thread:$0]  %s254_s1, 16, %s494_s7, [#allocation3]  }
 0x52d   :  { %v236_v53 = vpop.xlane.xlu0 %235 }
 0x52e   :  { %344 = vlog2.f32 %v236_v53 }
 0x538   :  { %v345_v54 = vpop.eup %344 }
 0x539   :  { %v238_v55 = vmul.f32 0.6931472, %v345_v54 }
 0x53b   :  { %v239_v56 = vadd.f32 %v238_v55, %v230_v48 }
 0x53d   :  { %v240_v57 = vsub.f32 %v224_v45, %v239_v56 }
 0x53f   :  { %241 = vst [vmem:[%s493_s6] sm:$0x1] %v240_v57 }
 0x540   :  { %368 = dma.done.wait [#allocation3], 16  }
 0x541   :  { %369 = vsyncadd [#allocation3], 4294967280 }
 0x542   :  { %262 = vsyncpa [#allocation3], 1 }

</bundles_post_ra>
